<compile_context>
chip_gen: v6e
topology: v6e:2x2x1
jax: 0.10.0
libtpu: 0.0.40
codegen_flags: <defaults>
</compile_context>

<pallas_src>
import jax
import jax.numpy as jnp
from jax import lax
from jax.experimental import pallas as pl
from jax.experimental.pallas import tpu as pltpu


def _round_up(n: int, m: int) -> int:
    return ((n + m - 1) // m) * m


def regression_head_kernel(x_ref, w1_ref, b1_ref, w2_ref, b2_ref, o_ref):
    # dense: x @ W1.T  — torch (out, in) layout kept, contract dim 1 of both.
    h = lax.dot_general(
        x_ref[...], w1_ref[...],
        dimension_numbers=(((1,), (1,)), ((), ())),
        preferred_element_type=jnp.float32,
    )
    h = h + b1_ref[...]
    h = jnp.tanh(h)  # EUP slot; operand kept in f32 (v5e has no bf16 EUP path)

    # out_proj: h @ W2_pad.T  -> lane-dense (TB, L_pad) slab.
    y = lax.dot_general(
        h.astype(w2_ref.dtype), w2_ref[...],
        dimension_numbers=(((1,), (1,)), ((), ())),
        preferred_element_type=jnp.float32,
    )
    y = y + b2_ref[...]
    o_ref[...] = y.astype(o_ref.dtype)
    # TODO(synk): dropout is identity in eval mode; a training-mode kernel
    # would build a mask with pltpu.prng_seed / pltpu.prng_random_bits.


def regression_head(x, w_dense, b_dense, w_out, b_out, *, block_b: int = 256):
    """x: (B, H).  w_dense: (H, H) torch (out,in) layout.  w_out: (L, H)."""
    B, H = x.shape
    L = w_out.shape[0]

    # Lane-dense output: pad num_labels up to a multiple of 128 (zeros).
    L_pad = _round_up(max(L, 1), 128)

    # Batch tile: sublane-aligned (8 rows f32 / 16 rows for 2-byte dtypes),
    # capped at block_b so big batches get pipelined + megacore-sharded.
    min_rows = 8 if jnp.dtype(x.dtype).itemsize >= 4 else 16
    TB = min(_round_up(block_b, min_rows), _round_up(B, min_rows))
    B_pad = _round_up(B, TB)

    x_p = x if B_pad == B else jnp.pad(x, ((0, B_pad - B), (0, 0)))
    b1 = b_dense.reshape(1, H)
    w2_p = jnp.pad(w_out, ((0, L_pad - L), (0, 0)))          # (L_pad, H), zero rows
    b2_p = jnp.pad(b_out, (0, L_pad - L)).reshape(1, L_pad)  # (1, L_pad)

    grid = (B_pad // TB,)

    out = pl.pallas_call(
        regression_head_kernel,
        out_shape=jax.ShapeDtypeStruct((B_pad, L_pad), x.dtype),
        grid=grid,
        in_specs=[
            pl.BlockSpec((TB, H), lambda i: (i, 0)),       # x tile (pipelined)
            pl.BlockSpec((H, H), lambda i: (0, 0)),        # dense W (resident)
            pl.BlockSpec((1, H), lambda i: (0, 0)),        # dense b (resident)
            pl.BlockSpec((L_pad, H), lambda i: (0, 0)),    # out_proj W padded
            pl.BlockSpec((1, L_pad), lambda i: (0, 0)),    # out_proj b padded
        ],
        out_specs=pl.BlockSpec((TB, L_pad), lambda i: (i, 0)),
        compiler_params=pltpu.CompilerParams(
            dimension_semantics=("parallel",),
        ),
    )(x_p, w_dense, b1, w2_p, b2_p)

    return out[:B, :L]


def regression_head_ref(x, w_dense, b_dense, w_out, b_out):
    h = jnp.tanh(x @ w_dense.T + b_dense)
    return h @ w_out.T + b_out


if __name__ == "__main__":
    # Small shapes consistent with the module: hidden_size=128, num_labels=3.
    B, H, L = 8, 128, 3

    key = jax.random.PRNGKey(0)
    kx, kw1, kb1, kw2, kb2 = jax.random.split(key, 5)

    x = jax.random.normal(kx, (B, H), dtype=jnp.float32)
    # Deterministic parameter init (synthetic — no checkpoint load).
    w_dense = jax.random.normal(kw1, (H, H), dtype=jnp.float32) * 0.02
    b_dense = jax.random.normal(kb1, (H,), dtype=jnp.float32) * 0.02
    w_out = jax.random.normal(kw2, (L, H), dtype=jnp.float32) * 0.02
    b_out = jax.random.normal(kb2, (L,), dtype=jnp.float32) * 0.02

    out = regression_head(x, w_dense, b_dense, w_out, b_out)
    out = jax.block_until_ready(out)

    ref = regression_head_ref(x, w_dense, b_dense, w_out, b_out)
    assert out.shape == (B, L), out.shape
    assert jnp.allclose(out, ref, atol=1e-5, rtol=1e-5), "mismatch vs reference"

    print("KERNEL_OK")
</pallas_src>

<mosaic_0001>
module attributes {stable_mosaic.version = 11 : i64} {
  func.func @regression_head_kernel(%arg0: i32, %arg1: memref<8x128xf32, #tpu.memory_space<vmem>>, %arg2: memref<128x128xf32, #tpu.memory_space<vmem>>, %arg3: memref<1x128xf32, #tpu.memory_space<vmem>>, %arg4: memref<128x128xf32, #tpu.memory_space<vmem>>, %arg5: memref<1x128xf32, #tpu.memory_space<vmem>>, %arg6: memref<8x128xf32, #tpu.memory_space<vmem>>) attributes {dimension_semantics = [#tpu.dimension_semantics<parallel>], iteration_bounds = array<i64: 1>, scalar_prefetch = 0 : i64, scratch_operands = 0 : i64, tpu.core_type = #tpu.core_type<tc>, window_params = [{transform_indices = @transform_0, window_bounds = array<i64: 8, 128>}, {pipeline_mode = #tpu.pipeline_mode<synchronous>, transform_indices = @transform_1, window_bounds = array<i64: 128, 128>}, {pipeline_mode = #tpu.pipeline_mode<synchronous>, transform_indices = @transform_2, window_bounds = array<i64: 1, 128>}, {pipeline_mode = #tpu.pipeline_mode<synchronous>, transform_indices = @transform_3, window_bounds = array<i64: 128, 128>}, {pipeline_mode = #tpu.pipeline_mode<synchronous>, transform_indices = @transform_4, window_bounds = array<i64: 1, 128>}, {transform_indices = @transform_5, window_bounds = array<i64: 8, 128>}]} {
    %c0 = arith.constant 0 : index
    %c0_0 = arith.constant 0 : index
    %0 = vector.load %arg1[%c0, %c0_0] : memref<8x128xf32, #tpu.memory_space<vmem>>, vector<8x128xf32>
    %c0_1 = arith.constant 0 : index
    %c0_2 = arith.constant 0 : index
    %1 = vector.load %arg2[%c0_1, %c0_2] : memref<128x128xf32, #tpu.memory_space<vmem>>, vector<128x128xf32>
    %cst = arith.constant dense<0.000000e+00> : vector<8x128xf32>
    %2 = tpu.matmul %0, %1, %cst {dimension_numbers = #tpu.dot_dimension_numbers<[1], [1], [0], [0], [0, 0, 1, 0], [], []>} : vector<8x128xf32>, vector<128x128xf32>, vector<8x128xf32> -> vector<8x128xf32>
    %c0_3 = arith.constant 0 : index
    %c0_4 = arith.constant 0 : index
    %3 = vector.load %arg3[%c0_3, %c0_4] : memref<1x128xf32, #tpu.memory_space<vmem>>, vector<1x128xf32>
    %4 = vector.broadcast %3 : vector<1x128xf32> to vector<8x128xf32>
    %5 = arith.addf %2, %4 : vector<8x128xf32>
    %6 = math.tanh %5 : vector<8x128xf32>
    %c0_5 = arith.constant 0 : index
    %c0_6 = arith.constant 0 : index
    %7 = vector.load %arg4[%c0_5, %c0_6] : memref<128x128xf32, #tpu.memory_space<vmem>>, vector<128x128xf32>
    %cst_7 = arith.constant dense<0.000000e+00> : vector<8x128xf32>
    %8 = tpu.matmul %6, %7, %cst_7 {dimension_numbers = #tpu.dot_dimension_numbers<[1], [1], [0], [0], [0, 0, 1, 0], [], []>} : vector<8x128xf32>, vector<128x128xf32>, vector<8x128xf32> -> vector<8x128xf32>
    %c0_8 = arith.constant 0 : index
    %c0_9 = arith.constant 0 : index
    %9 = vector.load %arg5[%c0_8, %c0_9] : memref<1x128xf32, #tpu.memory_space<vmem>>, vector<1x128xf32>
    %10 = vector.broadcast %9 : vector<1x128xf32> to vector<8x128xf32>
    %11 = arith.addf %8, %10 : vector<8x128xf32>
    %c0_10 = arith.constant 0 : index
    %c0_11 = arith.constant 0 : index
    %12 = vector.load %arg6[%c0_10, %c0_11] : memref<8x128xf32, #tpu.memory_space<vmem>>, vector<8x128xf32>
    tpu.vector_store %arg6[%c0_10, %c0_11], %11 {strides = array<i32>} : memref<8x128xf32, #tpu.memory_space<vmem>>, vector<8x128xf32>,
    return
  }
  func.func @transform_0(%arg0: i32) -> (i32, i32) {
    %c0_i32 = arith.constant 0 : i32
    %c0_i32_0 = arith.constant 0 : i32
    return %arg0, %c0_i32 : i32, i32
  }
  func.func @transform_1(%arg0: i32) -> (i32, i32) {
    %c0_i32 = arith.constant 0 : i32
    %c0_i32_0 = arith.constant 0 : i32
    %c0_i32_1 = arith.constant 0 : i32
    return %c0_i32, %c0_i32_0 : i32, i32
  }
  func.func @transform_2(%arg0: i32) -> (i32, i32) {
    %c0_i32 = arith.constant 0 : i32
    %c0_i32_0 = arith.constant 0 : i32
    %c0_i32_1 = arith.constant 0 : i32
    return %c0_i32, %c0_i32_0 : i32, i32
  }
  func.func @transform_3(%arg0: i32) -> (i32, i32) {
    %c0_i32 = arith.constant 0 : i32
    %c0_i32_0 = arith.constant 0 : i32
    %c0_i32_1 = arith.constant 0 : i32
    return %c0_i32, %c0_i32_0 : i32, i32
  }
  func.func @transform_4(%arg0: i32) -> (i32, i32) {
    %c0_i32 = arith.constant 0 : i32
    %c0_i32_0 = arith.constant 0 : i32
    %c0_i32_1 = arith.constant 0 : i32
    return %c0_i32, %c0_i32_0 : i32, i32
  }
  func.func @transform_5(%arg0: i32) -> (i32, i32) {
    %c0_i32 = arith.constant 0 : i32
    %c0_i32_0 = arith.constant 0 : i32
    return %arg0, %c0_i32 : i32, i32
  }
}

</mosaic_0001>

<bundles_post_ra>
// kernel: tpu_custom_call.1
= control target key start
LH: loop header
LB: loop body
LE: loop exit
PB: predicated region body
PF: predicated region fallthrough
CT: control target
= control target key end

     0   :  { %10 = vsyncpa [#allocation3], 0  ;;  %s557_s0 = inlined_call_operand.hbm [shape: f32[8,128], index: 0, kind: input, shape index: {}]   ;;  %s558_s1 = inlined_call_operand.hbm [shape: f32[128,128], index: 1, kind: input, shape index: {}]   ;;  %s559_s2 = inlined_call_operand.vmem [shape: f32[1,128], index: 2, kind: input, shape index: {}]   ;;  %s560_s3 = inlined_call_operand.hbm [shape: f32[128,128], index: 3, kind: input, shape index: {}]   ;;  %s561_s4 = inlined_call_operand.vmem [shape: f32[1,128], index: 4, kind: input, shape index: {}]   ;;  %s562_s5 = inlined_call_operand.hbm [shape: f32[8,128], index: 5, kind: output, shape index: {}]  }
   0x1   :  { %11 = vsyncpa [#allocation6], 0 }
   0x2   :  { %12 = vsyncpa [#allocation4], 0  ;;  %s467_s18 = smov [#allocation5]  }
   0x3   :  { %s28_s19 = sshll.u32 %s467_s18, 4  ;;  %s29_s19 = int_to_ptr.vmem [resolvable:$true] %s28_s19 }
   0x4   :  { %s389_s20 = scalar_lea.vmem %s29_s19, 2048  ;;  %p394_p1 = scmp.lt.s32.totalorder %s29_s19, %s29_s19 }
   0x5   :  { %p390_p0 = scmp.ne.s32.totalorder %s29_s19, %s389_s20  ;;  %p395_p2 = scmp.lt.s32.totalorder %s389_s20, %s389_s20 }
   0x7   :  { %p396_p3 = por %p395_p2, %p394_p1 }
   0x9   :  { %p397_p4 = pnand %p396_p3, %p390_p0 }
   0xb   :  { %400 = shalt.err (!%p397_p4)
}
   0xc   :  { %s468_s21 = smov 128   ;;  %s469_s22 = smov 8  }
   0xd   :  { %34 = dma.hbm_to_vmem [thread:$0]  %s558_s1, 2048, %s29_s19, [#allocation6], %s468_s21, %s468_s21, %s469_s22  }
   0xe   :  { %s470_s25 = smov [#allocation2]   ;;  %s471_s27 = smov [#allocation7]  }
   0xf   :  { %s19_s26 = sshll.u32 %s470_s25, 4  ;;  %s42_s28 = sshll.u32 %s471_s27, 4  ;;  %s20_s26 = int_to_ptr.vmem [resolvable:$true] %s19_s26  ;;  %s43_s28 = int_to_ptr.vmem [resolvable:$true] %s42_s28 }
  0x10   :  { %s409_s29 = scalar_lea.vmem %s20_s26, 128  ;;  %p414_p6 = scmp.lt.s32.totalorder %s20_s26, %s20_s26 }
  0x11   :  { %p410_p5 = scmp.ne.s32.totalorder %s20_s26, %s409_s29  ;;  %p415_p7 = scmp.lt.s32.totalorder %s409_s29, %s409_s29 }
  0x13   :  { %p416_p8 = por %p415_p7, %p414_p6 }
  0x15   :  { %p417_p9 = pnand %p416_p8, %p410_p5 }
  0x17   :  { %420 = shalt.err (!%p417_p9)
}
  0x18   :  { %22 = dma.hbm_to_vmem [thread:$0]  %s557_s0, 128, %s20_s26, [#allocation3]  }
  0x19   :  { %s429_s7 = scalar_lea.vmem %s43_s28, 2048  ;;  %p434_p11 = scmp.lt.s32.totalorder %s43_s28, %s43_s28 }
  0x1a   :  { %p430_p10 = scmp.ne.s32.totalorder %s43_s28, %s429_s7  ;;  %p435_p12 = scmp.lt.s32.totalorder %s429_s7, %s429_s7 }
  0x1c   :  { %p436_p13 = por %p435_p12, %p434_p11 }
  0x1e   :  { %p437_p0 = pnand %p436_p13, %p430_p10 }
  0x20   :  { %440 = shalt.err (!%p437_p0)
}
  0x21   :  { %48 = dma.hbm_to_vmem [thread:$0]  %s560_s3, 2048, %s43_s28, [#allocation6], %s468_s21, %s468_s21, %s469_s22  }
  0x22   :  { %461 = dma.done.wait [#allocation3], 128  }
  0x23   :  { %462 = vsyncadd [#allocation3], 4294967168 }
  0x24   :  { %463 = dma.done.wait [#allocation6], 4096  }
  0x25   :  { %464 = vsyncadd [#allocation6], 4294963200  ;;  %v472_v0 = vmov 0.0   ;;  %vm473_vm0 = vmmov 0   ;;  %v76_v1 = vld [vmem:[#allocation5 + $0x78] sm:$0xff]  ;;  %v75_v2 = vld [vmem:[#allocation5 + $0x70] sm:$0xff] }
  0x26   :  { %301 = vmatprep.subr.mxu0 %v472_v0  ;;  %333 = vmatprep.mubr.msk.f32.mxu0 %vm473_vm0, %v472_v0  ;;  %v170_v3 = vld [vmem:[#allocation7 + $0x78] sm:$0xff]  ;;  %v74_v4 = vld [vmem:[#allocation5 + $0x68] sm:$0xff]  ;;  %v169_v5 = vld [vmem:[#allocation7 + $0x70] sm:$0xff]  ;;  %s474_s11 = smov [#allocation8]  }
  0x27   :  { %336 = vmatprep.subr.mxu1 %v472_v0  ;;  %368 = vmatprep.mubr.msk.f32.mxu1 %vm473_vm0, %v472_v0  ;;  %v73_v6 = vld [vmem:[#allocation5 + $0x60] sm:$0xff]  ;;  %v168_v7 = vld [vmem:[#allocation7 + $0x68] sm:$0xff]  ;;  %v72_v8 = vld [vmem:[#allocation5 + $0x58] sm:$0xff]  ;;  %s255_s12 = sshll.u32 %s474_s11, 4  ;;  %s256_s12 = int_to_ptr.vmem [resolvable:$true] %s255_s12 }
  0x28   :  { %302 = vmatpush3.xpose.msra.mxu0 %v76_v1  ;;  %337 = vmatpush3.xpose.msra.mxu1 %v170_v3  ;;  %v167_v9 = vld [vmem:[#allocation7 + $0x60] sm:$0xff]  ;;  %v71_v10 = vld [vmem:[#allocation5 + $0x50] sm:$0xff]  ;;  %v166_v11 = vld [vmem:[#allocation7 + $0x58] sm:$0xff]  ;;  %s441_s13 = scalar_lea.vmem %s256_s12, 128  ;;  %p446_p2 = scmp.lt.s32.totalorder %s256_s12, %s256_s12 }
  0x29   :  { %303 = vmatprep.subr.mxu0 %v472_v0  ;;  %338 = vmatprep.subr.mxu1 %v472_v0  ;;  %v70_v12 = vld [vmem:[#allocation5 + $0x48] sm:$0xff]  ;;  %v165_v13 = vld [vmem:[#allocation7 + $0x50] sm:$0xff]  ;;  %v69_v14 = vld [vmem:[#allocation5 + $0x40] sm:$0xff]  ;;  %p442_p1 = scmp.ne.s32.totalorder %s256_s12, %s441_s13  ;;  %p447_p3 = scmp.lt.s32.totalorder %s441_s13, %s441_s13 }
  0x2a   :  { %v164_v15 = vld [vmem:[#allocation7 + $0x48] sm:$0xff]  ;;  %v68_v16 = vld [vmem:[#allocation5 + $0x38] sm:$0xff]  ;;  %v163_v17 = vld [vmem:[#allocation7 + $0x40] sm:$0xff] }
  0x2b   :  { %v67_v18 = vld [vmem:[#allocation5 + $0x30] sm:$0xff]  ;;  %v162_v19 = vld [vmem:[#allocation7 + $0x38] sm:$0xff]  ;;  %v66_v20 = vld [vmem:[#allocation5 + $0x28] sm:$0xff]  ;;  %p448_p4 = por %p447_p3, %p446_p2 }
  0x2c   :  { %304 = vmatpush3.xpose.msra.mxu0 %v75_v2  ;;  %339 = vmatpush3.xpose.msra.mxu1 %v169_v5  ;;  %v161_v21 = vld [vmem:[#allocation7 + $0x30] sm:$0xff]  ;;  %v65_v22 = vld [vmem:[#allocation5 + $0x20] sm:$0xff]  ;;  %v160_v23 = vld [vmem:[#allocation7 + $0x28] sm:$0xff] }
  0x2d   :  { %305 = vmatprep.subr.mxu0 %v472_v0  ;;  %340 = vmatprep.subr.mxu1 %v472_v0  ;;  %v64_v24 = vld [vmem:[#allocation5 + $0x18] sm:$0xff]  ;;  %v159_v25 = vld [vmem:[#allocation7 + $0x20] sm:$0xff]  ;;  %v63_v26 = vld [vmem:[#allocation5 + $0x10] sm:$0xff]  ;;  %p449_p5 = pnand %p448_p4, %p442_p1 }
  0x2e   :  { %v62_v27 = vld [vmem:[#allocation5 + $0x8] sm:$0xff]  ;;  %v61_v28 = vld [vmem:[#allocation5] sm:$0xff]  ;;  %v60_v29 = vld [vmem:[#allocation2] sm:$0xff] }
  0x2f   :  { %v158_v30 = vld [vmem:[#allocation7 + $0x18] sm:$0xff]  ;;  %v157_v31 = vld [vmem:[#allocation7 + $0x10] sm:$0xff]  ;;  %v156_v32 = vld [vmem:[#allocation7 + $0x8] sm:$0xff] }
  0x30   :  { %306 = vmatpush3.xpose.msra.mxu0 %v74_v4  ;;  %341 = vmatpush3.xpose.msra.mxu1 %v168_v7  ;;  %v155_v33 = vld [vmem:[#allocation7] sm:$0xff]  ;;  %v265_v34 = vld [vmem:[%s559_s2] ss:$0 sm:$0xff] }
  0x31   :  { %307 = vmatprep.subr.mxu0 %v472_v0  ;;  %342 = vmatprep.subr.mxu1 %v472_v0  ;;  %v266_v39 = vld [vmem:[%s561_s4] ss:$0 sm:$0xff] }
  0x34   :  { %308 = vmatpush3.xpose.msra.mxu0 %v73_v6  ;;  %343 = vmatpush3.xpose.msra.mxu1 %v167_v9 }
  0x35   :  { %309 = vmatprep.subr.mxu0 %v472_v0  ;;  %344 = vmatprep.subr.mxu1 %v472_v0 }
  0x38   :  { %310 = vmatpush3.xpose.msra.mxu0 %v72_v8  ;;  %345 = vmatpush3.xpose.msra.mxu1 %v166_v11 }
  0x39   :  { %311 = vmatprep.subr.mxu0 %v472_v0  ;;  %346 = vmatprep.subr.mxu1 %v472_v0 }
  0x3c   :  { %312 = vmatpush3.xpose.msra.mxu0 %v71_v10  ;;  %347 = vmatpush3.xpose.msra.mxu1 %v165_v13 }
  0x3d   :  { %313 = vmatprep.subr.mxu0 %v472_v0  ;;  %348 = vmatprep.subr.mxu1 %v472_v0 }
  0x40   :  { %314 = vmatpush3.xpose.msra.mxu0 %v70_v12  ;;  %349 = vmatpush3.xpose.msra.mxu1 %v164_v15 }
  0x41   :  { %315 = vmatprep.subr.mxu0 %v472_v0  ;;  %350 = vmatprep.subr.mxu1 %v472_v0 }
  0x44   :  { %316 = vmatpush3.xpose.msra.mxu0 %v69_v14  ;;  %351 = vmatpush3.xpose.msra.mxu1 %v163_v17 }
  0x45   :  { %317 = vmatprep.subr.mxu0 %v472_v0  ;;  %352 = vmatprep.subr.mxu1 %v472_v0 }
  0x48   :  { %318 = vmatpush3.xpose.msra.mxu0 %v68_v16  ;;  %353 = vmatpush3.xpose.msra.mxu1 %v162_v19 }
  0x49   :  { %319 = vmatprep.subr.mxu0 %v472_v0  ;;  %354 = vmatprep.subr.mxu1 %v472_v0 }
  0x4c   :  { %320 = vmatpush3.xpose.msra.mxu0 %v67_v18  ;;  %355 = vmatpush3.xpose.msra.mxu1 %v161_v21 }
  0x4d   :  { %321 = vmatprep.subr.mxu0 %v472_v0  ;;  %356 = vmatprep.subr.mxu1 %v472_v0 }
  0x50   :  { %322 = vmatpush3.xpose.msra.mxu0 %v66_v20  ;;  %357 = vmatpush3.xpose.msra.mxu1 %v160_v23 }
  0x51   :  { %323 = vmatprep.subr.mxu0 %v472_v0  ;;  %358 = vmatprep.subr.mxu1 %v472_v0 }
  0x54   :  { %324 = vmatpush3.xpose.msra.mxu0 %v65_v22  ;;  %359 = vmatpush3.xpose.msra.mxu1 %v159_v25 }
  0x55   :  { %325 = vmatprep.subr.mxu0 %v472_v0  ;;  %360 = vmatprep.subr.mxu1 %v472_v0 }
  0x58   :  { %326 = vmatpush3.xpose.msra.mxu0 %v64_v24  ;;  %361 = vmatpush3.xpose.msra.mxu1 %v158_v30 }
  0x59   :  { %327 = vmatprep.subr.mxu0 %v472_v0  ;;  %362 = vmatprep.subr.mxu1 %v472_v0 }
  0x5c   :  { %328 = vmatpush3.xpose.msra.mxu0 %v63_v26  ;;  %363 = vmatpush3.xpose.msra.mxu1 %v157_v31 }
  0x5d   :  { %329 = vmatprep.subr.mxu0 %v472_v0  ;;  %364 = vmatprep.subr.mxu1 %v472_v0 }
  0x60   :  { %330 = vmatpush3.xpose.msra.mxu0 %v62_v27  ;;  %365 = vmatpush3.xpose.msra.mxu1 %v156_v32 }
  0x61   :  { %331 = vmatprep.subr.mxu0 %v472_v0  ;;  %366 = vmatprep.subr.mxu1 %v472_v0 }
  0x64   :  { %332 = vmatpush3.xpose.msra.mxu0 %v61_v28  ;;  %367 = vmatpush3.xpose.msra.mxu1 %v155_v33 }
  0x67   :  { %334 = vmatmul.mubr.f32.vlgmr.msra.gmra.mxu0 %v60_v29 }
 0x127   :  { %v150_v35 = vpop.f32.mrf.mxu0 }
 0x128   :  { %v151_v36 = vadd.f32 %v265_v34, %v150_v35 }
 0x129   :  { %v335_v37 = vpop.f32.mrf.mxu0 }
 0x12a   :  { %379 = vtanh.f32 %v151_v36 }
 0x137   :  { %v380_v38 = vpop.eup %379 }
 0x138   :  { %369 = vmatmul.mubr.f32.vlgmr.msra.gmra.mxu1 %v380_v38 }
 0x1f8   :  { %v244_v40 = vpop.f32.mrf.mxu1 }
 0x1f9   :  { %v245_v41 = vadd.f32 %v266_v39, %v244_v40 }
 0x1fa   :  { %v370_v42 = vpop.f32.mrf.mxu1 }
 0x1fb   :  { %248 = vst [vmem:[#allocation8] sm:$0xff] %v245_v41 }
 0x1fc   :  { %452 = shalt.err (!%p449_p5)
}
 0x1fd   :  { %258 = dma.vmem_to_hbm [thread:$0]  %s256_s12, 128, %s562_s5, [#allocation4]  }
 0x1fe   :  { %465 = dma.done.wait [#allocation4], 128  }
 0x1ff   :  { %466 = vsyncadd [#allocation4], 4294967168 }
 0x200   :  { %262 = vsyncpa [#allocation3], 1 }
 0x201   :  { %263 = vsyncpa [#allocation6], 1 }
 0x202   :  { %264 = vsyncpa [#allocation4], 1 }

</bundles_post_ra>
